<compile_context>
chip_gen: v7x
topology: tpu7x:2x2x1
jax: 0.10.0
libtpu: 0.0.40
codegen_flags: <defaults>
</compile_context>

<pallas_src>
import functools

import jax
import jax.numpy as jnp
from jax.experimental import pallas as pl
from jax.experimental.pallas import tpu as pltpu


# ----------------------------- kernels ------------------------------------ #

def _resblock_kernel_shortcut(x_ref, w0_ref, b0_ref, w1_ref, b1_ref, ws_ref, o_ref):
    """One batch tile, projection shortcut (x_s = x @ ws)."""
    x = x_ref[...]                                       # (tm, size_in), io dtype
    h = jnp.maximum(x, 0.0)                              # ReLU
    net = jnp.dot(h, w0_ref[...],
                  preferred_element_type=jnp.float32) + b0_ref[...]     # f32
    net = jnp.maximum(net, 0.0)
    dx = jnp.dot(net.astype(w1_ref.dtype), w1_ref[...],
                 preferred_element_type=jnp.float32) + b1_ref[...]      # f32
    x_s = jnp.dot(x, ws_ref[...], preferred_element_type=jnp.float32)
    o_ref[...] = (x_s + dx).astype(o_ref.dtype)


def _resblock_kernel_identity(x_ref, w0_ref, b0_ref, w1_ref, b1_ref, o_ref):
    """One batch tile, identity shortcut (size_in == size_out)."""
    x = x_ref[...]
    h = jnp.maximum(x, 0.0)
    net = jnp.dot(h, w0_ref[...],
                  preferred_element_type=jnp.float32) + b0_ref[...]
    net = jnp.maximum(net, 0.0)
    dx = jnp.dot(net.astype(w1_ref.dtype), w1_ref[...],
                 preferred_element_type=jnp.float32) + b1_ref[...]
    o_ref[...] = (x.astype(jnp.float32) + dx).astype(o_ref.dtype)


# ----------------------------- helpers ------------------------------------ #

def _round_up(x, m):
    return -(-x // m) * m


def _choose_tm(n_rows, size_in, size_out_p, size_h, io_bytes):
    """Largest power-of-two batch tile that (a) fits a conservative VMEM budget
    (under the default scoped limit on v5e/v6e and within v7x's 64 MiB VMEM)
    and (b) keeps >= 2 grid steps so v7x can split the parallel axis over its
    two TensorCores."""
    weight_bytes = (size_in * size_h + size_h * size_out_p
                    + size_in * size_out_p) * io_bytes       # single-buffered
    weight_bytes += (size_h + size_out_p) * 4                # f32 biases
    budget = 24 * 1024 * 1024
    for cand in (1024, 512, 256, 128):
        act_bytes = 2 * cand * (size_in * io_bytes + size_out_p * 4)  # x/out, 2x buffered
        if weight_bytes + act_bytes <= budget and n_rows >= 2 * cand:
            return cand
    # Small batch: a single sublane-aligned tile (grid of 1-2 steps).
    return min(128, max(8, _round_up(n_rows, 8)))


# ----------------------------- wrapper ------------------------------------ #

@functools.partial(jax.jit, static_argnames=("tm", "io_dtype"))
def resnet_block_fc(x, params, *, tm=None, io_dtype=None):
    """Forward pass of ResnetBlockFC.

    x: [N, size_in].  params: dict with
      w0t (size_in, size_h), b0 (1, size_h),
      w1t (size_h, size_out), b1 (1, size_out),
      optional wst (size_in, size_out) when size_in != size_out.
    io_dtype: optional dtype (e.g. jnp.bfloat16) for HBM-resident x / weights;
      MXU accumulation stays f32 and the output keeps x.dtype.
    """
    out_dtype = x.dtype
    n, size_in = x.shape
    w0t, b0 = params["w0t"], params["b0"]
    w1t, b1 = params["w1t"], params["b1"]
    wst = params.get("wst")
    size_h = w0t.shape[1]
    size_out = w1t.shape[1]

    # --- lane padding of the output feature dim (lane-dense stores) -------- #
    so_p = _round_up(size_out, 128)
    if so_p != size_out:
        pad = so_p - size_out
        w1t = jnp.pad(w1t, ((0, 0), (0, pad)))
        b1 = jnp.pad(b1, ((0, 0), (0, pad)))
        if wst is not None:
            wst = jnp.pad(wst, ((0, 0), (0, pad)))
        else:
            # Identity shortcut cannot write a lane-padded output directly;
            # use an explicit zero-padded identity projection instead.
            wst = jnp.eye(size_in, so_p, dtype=w0t.dtype)

    # --- optional reduced-precision HBM I/O (f32 accumulation) ------------- #
    if io_dtype is not None:
        x = x.astype(io_dtype)
        w0t = w0t.astype(io_dtype)
        w1t = w1t.astype(io_dtype)
        if wst is not None:
            wst = wst.astype(io_dtype)
    io_bytes = jnp.dtype(x.dtype).itemsize

    # --- batch tiling (adaptive tm, ragged N via zero row padding) --------- #
    if tm is None:
        tm = _choose_tm(n, size_in, so_p, size_h, io_bytes)
    n_pad = _round_up(n, tm)
    if n_pad != n:
        x = jnp.pad(x, ((0, n_pad - n), (0, 0)))
    grid = (n_pad // tm,)

    const = lambda i: (0, 0)
    single = pl.Buffered(1)   # grid-invariant operands: no double buffering
    x_spec = pl.BlockSpec((tm, size_in), lambda i: (i, 0))
    o_spec = pl.BlockSpec((tm, so_p), lambda i: (i, 0))
    w0_spec = pl.BlockSpec((size_in, size_h), const, pipeline_mode=single)
    b0_spec = pl.BlockSpec((1, size_h), const, pipeline_mode=single)
    w1_spec = pl.BlockSpec((size_h, so_p), const, pipeline_mode=single)
    b1_spec = pl.BlockSpec((1, so_p), const, pipeline_mode=single)

    if wst is not None:
        ws_spec = pl.BlockSpec((size_in, so_p), const, pipeline_mode=single)
        in_specs = [x_spec, w0_spec, b0_spec, w1_spec, b1_spec, ws_spec]
        kernel = _resblock_kernel_shortcut
        args = (x, w0t, b0, w1t, b1, wst)
        shortcut_flops = 2 * size_in * so_p
        shortcut_bytes = size_in * so_p * io_bytes
    else:
        in_specs = [x_spec, w0_spec, b0_spec, w1_spec, b1_spec]
        kernel = _resblock_kernel_identity
        args = (x, w0t, b0, w1t, b1)
        shortcut_flops = 0
        shortcut_bytes = 0

    flops = n_pad * (2 * size_in * size_h + 2 * size_h * so_p + shortcut_flops)
    bytes_accessed = (n_pad * size_in * io_bytes
                      + n_pad * so_p * jnp.dtype(out_dtype).itemsize
                      + (size_in * size_h + size_h * so_p) * io_bytes
                      + shortcut_bytes
                      + (size_h + so_p) * 4)
    cost = pl.CostEstimate(flops=flops, transcendentals=0,
                           bytes_accessed=bytes_accessed)

    out = pl.pallas_call(
        kernel,
        out_shape=jax.ShapeDtypeStruct((n_pad, so_p), out_dtype),
        grid_spec=pltpu.PrefetchScalarGridSpec(
            num_scalar_prefetch=0,
            grid=grid,
            in_specs=in_specs,
            out_specs=o_spec,
        ),
        compiler_params=pltpu.CompilerParams(
            dimension_semantics=("parallel",)),
        cost_estimate=cost,
    )(*args)

    if n_pad != n or so_p != size_out:
        out = out[:n, :size_out]
    return out


# ------------------------ deterministic init ------------------------------ #

def init_resnet_block_fc(key, size_in, size_out=None, size_h=None):
    """Mirrors ResnetBlockFC.__init__ (kaiming_normal fan_in, zero biases,
    zero fc_1 weight, optional kaiming-normal shortcut)."""
    if size_out is None:
        size_out = size_in
    if size_h is None:
        size_h = min(size_in, size_out)

    k0, ks = jax.random.split(key)

    std0 = (2.0 / size_in) ** 0.5
    w0 = std0 * jax.random.normal(k0, (size_h, size_in), jnp.float32)   # (out, in)
    b0 = jnp.zeros((size_h,), jnp.float32)

    w1 = jnp.zeros((size_out, size_h), jnp.float32)                     # zero init
    b1 = jnp.zeros((size_out,), jnp.float32)

    params = {
        "w0t": jnp.transpose(w0),                 # (size_in, size_h)
        "b0": b0.reshape(1, size_h),
        "w1t": jnp.transpose(w1),                 # (size_h, size_out)
        "b1": b1.reshape(1, size_out),
    }

    if size_in != size_out:
        std_s = (2.0 / size_in) ** 0.5
        ws = std_s * jax.random.normal(ks, (size_out, size_in), jnp.float32)
        params["wst"] = jnp.transpose(ws)         # (size_in, size_out)

    return params


def reference_resnet_block_fc(x, params):
    """Pure-JAX reference mirroring the PyTorch forward (full f32 matmuls)."""
    with jax.default_matmul_precision("highest"):
        h = jnp.maximum(x, 0.0)
        net = h @ params["w0t"] + params["b0"]
        net = jnp.maximum(net, 0.0)
        dx = net @ params["w1t"] + params["b1"]
        x_s = x @ params["wst"] if "wst" in params else x
        return x_s + dx


# ------------------------------- main -------------------------------------- #

if __name__ == "__main__":
    key = jax.random.PRNGKey(0)
    k_x, k_p, k_w1, k_x2, k_p2, k_w12, k_x3, k_p3, k_w13 = jax.random.split(key, 9)

    # --- config A: projection shortcut, exact batch, f32 + bf16 I/O -------- #
    N, size_in, size_out = 256, 64, 128               # size_h = min = 64
    x = jax.random.normal(k_x, (N, size_in), jnp.float32)
    params = init_resnet_block_fc(k_p, size_in, size_out)
    # PyTorch zero-inits fc_1 (making dx == 0); use a non-zero fc_1 weight so
    # the numerical check actually exercises the main path.
    size_h = params["w0t"].shape[1]
    params["w1t"] = 0.1 * jax.random.normal(k_w1, (size_h, size_out), jnp.float32)

    ref = reference_resnet_block_fc(x, params)

    out = jax.block_until_ready(resnet_block_fc(x, params))
    assert out.shape == (N, size_out) and out.dtype == x.dtype
    assert jnp.allclose(out, ref, atol=1e-4, rtol=1e-4), "f32 shortcut path mismatch"

    # bf16 HBM I/O with f32 MXU accumulation (memory-bound-path optimization).
    out_bf16 = jax.block_until_ready(resnet_block_fc(x, params, io_dtype=jnp.bfloat16))
    assert out_bf16.shape == (N, size_out) and out_bf16.dtype == x.dtype
    assert jnp.allclose(out_bf16, ref, atol=1e-1, rtol=1e-1), "bf16 I/O path mismatch"

    # --- config B: identity shortcut, ragged batch, size not 128-aligned --- #
    N2, size2 = 200, 96                                # exercises row + lane padding
    x2 = jax.random.normal(k_x2, (N2, size2), jnp.float32)
    params2 = init_resnet_block_fc(k_p2, size2)
    params2["w1t"] = 0.1 * jax.random.normal(k_w12, (size2, size2), jnp.float32)
    ref2 = reference_resnet_block_fc(x2, params2)
    out2 = jax.block_until_ready(resnet_block_fc(x2, params2))
    assert out2.shape == (N2, size2)
    assert jnp.allclose(out2, ref2, atol=1e-4, rtol=1e-4), "padded identity path mismatch"

    # --- config C: identity shortcut, 128-aligned (true identity kernel) --- #
    N3, size3 = 256, 128
    x3 = jax.random.normal(k_x3, (N3, size3), jnp.float32)
    params3 = init_resnet_block_fc(k_p3, size3)
    params3["w1t"] = 0.1 * jax.random.normal(k_w13, (size3, size3), jnp.float32)
    ref3 = reference_resnet_block_fc(x3, params3)
    out3 = jax.block_until_ready(resnet_block_fc(x3, params3))
    assert out3.shape == (N3, size3)
    assert jnp.allclose(out3, ref3, atol=1e-4, rtol=1e-4), "identity path mismatch"

    print("KERNEL_OK")
</pallas_src>

<mosaic_0001>
module attributes {stable_mosaic.version = 11 : i64} {
  func.func @_resblock_kernel_shortcut(%arg0: i32, %arg1: memref<128x64xf32, #tpu.memory_space<vmem>>, %arg2: memref<64x64xf32, #tpu.memory_space<vmem>>, %arg3: memref<1x64xf32, #tpu.memory_space<vmem>>, %arg4: memref<64x128xf32, #tpu.memory_space<vmem>>, %arg5: memref<1x128xf32, #tpu.memory_space<vmem>>, %arg6: memref<64x128xf32, #tpu.memory_space<vmem>>, %arg7: memref<128x128xf32, #tpu.memory_space<vmem>>) attributes {dimension_semantics = [#tpu.dimension_semantics<parallel>], iteration_bounds = array<i64: 2>, scalar_prefetch = 0 : i64, scratch_operands = 0 : i64, tpu.core_type = #tpu.core_type<tc>, window_params = [{transform_indices = @transform_0, window_bounds = array<i64: 128, 64>}, {pipeline_mode = #tpu.pipeline_mode<synchronous>, transform_indices = @transform_1, window_bounds = array<i64: 64, 64>}, {pipeline_mode = #tpu.pipeline_mode<synchronous>, transform_indices = @transform_2, window_bounds = array<i64: 1, 64>}, {pipeline_mode = #tpu.pipeline_mode<synchronous>, transform_indices = @transform_3, window_bounds = array<i64: 64, 128>}, {pipeline_mode = #tpu.pipeline_mode<synchronous>, transform_indices = @transform_4, window_bounds = array<i64: 1, 128>}, {pipeline_mode = #tpu.pipeline_mode<synchronous>, transform_indices = @transform_5, window_bounds = array<i64: 64, 128>}, {transform_indices = @transform_6, window_bounds = array<i64: 128, 128>}]} {
    %c0 = arith.constant 0 : index
    %c0_0 = arith.constant 0 : index
    %0 = vector.load %arg1[%c0, %c0_0] : memref<128x64xf32, #tpu.memory_space<vmem>>, vector<128x64xf32>
    %cst = arith.constant 0.000000e+00 : f32
    %1 = vector.broadcast %cst : f32 to vector<128x64xf32>
    %2 = arith.maximumf %0, %1 : vector<128x64xf32>
    %c0_1 = arith.constant 0 : index
    %c0_2 = arith.constant 0 : index
    %3 = vector.load %arg2[%c0_1, %c0_2] : memref<64x64xf32, #tpu.memory_space<vmem>>, vector<64x64xf32>
    %cst_3 = arith.constant dense<0.000000e+00> : vector<128x64xf32>
    %4 = tpu.matmul %2, %3, %cst_3 {dimension_numbers = #tpu.dot_dimension_numbers<[1], [0], [0], [1], [0, 0, 1, 1], [], []>} : vector<128x64xf32>, vector<64x64xf32>, vector<128x64xf32> -> vector<128x64xf32>
    %c0_4 = arith.constant 0 : index
    %c0_5 = arith.constant 0 : index
    %5 = vector.load %arg3[%c0_4, %c0_5] : memref<1x64xf32, #tpu.memory_space<vmem>>, vector<1x64xf32>
    %6 = vector.broadcast %5 : vector<1x64xf32> to vector<128x64xf32>
    %7 = arith.addf %4, %6 : vector<128x64xf32>
    %cst_6 = arith.constant 0.000000e+00 : f32
    %8 = vector.broadcast %cst_6 : f32 to vector<128x64xf32>
    %9 = arith.maximumf %7, %8 : vector<128x64xf32>
    %c0_7 = arith.constant 0 : index
    %c0_8 = arith.constant 0 : index
    %10 = vector.load %arg4[%c0_7, %c0_8] : memref<64x128xf32, #tpu.memory_space<vmem>>, vector<64x128xf32>
    %cst_9 = arith.constant dense<0.000000e+00> : vector<128x128xf32>
    %11 = tpu.matmul %9, %10, %cst_9 {dimension_numbers = #tpu.dot_dimension_numbers<[1], [0], [0], [1], [0, 0, 1, 1], [], []>} : vector<128x64xf32>, vector<64x128xf32>, vector<128x128xf32> -> vector<128x128xf32>
    %c0_10 = arith.constant 0 : index
    %c0_11 = arith.constant 0 : index
    %12 = vector.load %arg5[%c0_10, %c0_11] : memref<1x128xf32, #tpu.memory_space<vmem>>, vector<1x128xf32>
    %13 = vector.broadcast %12 : vector<1x128xf32> to vector<128x128xf32>
    %14 = arith.addf %11, %13 : vector<128x128xf32>
    %c0_12 = arith.constant 0 : index
    %c0_13 = arith.constant 0 : index
    %15 = vector.load %arg6[%c0_12, %c0_13] : memref<64x128xf32, #tpu.memory_space<vmem>>, vector<64x128xf32>
    %cst_14 = arith.constant dense<0.000000e+00> : vector<128x128xf32>
    %16 = tpu.matmul %0, %15, %cst_14 {dimension_numbers = #tpu.dot_dimension_numbers<[1], [0], [0], [1], [0, 0, 1, 1], [], []>} : vector<128x64xf32>, vector<64x128xf32>, vector<128x128xf32> -> vector<128x128xf32>
    %17 = arith.addf %16, %14 : vector<128x128xf32>
    %c0_15 = arith.constant 0 : index
    %c0_16 = arith.constant 0 : index
    %18 = vector.load %arg7[%c0_15, %c0_16] : memref<128x128xf32, #tpu.memory_space<vmem>>, vector<128x128xf32>
    tpu.vector_store %arg7[%c0_15, %c0_16], %17 {strides = array<i32>} : memref<128x128xf32, #tpu.memory_space<vmem>>, vector<128x128xf32>,
    return
  }
  func.func @transform_0(%arg0: i32) -> (i32, i32) {
    %c0_i32 = arith.constant 0 : i32
    %c0_i32_0 = arith.constant 0 : i32
    return %arg0, %c0_i32 : i32, i32
  }
  func.func @transform_1(%arg0: i32) -> (i32, i32) {
    %c0_i32 = arith.constant 0 : i32
    %c0_i32_0 = arith.constant 0 : i32
    %c0_i32_1 = arith.constant 0 : i32
    return %c0_i32, %c0_i32_0 : i32, i32
  }
  func.func @transform_2(%arg0: i32) -> (i32, i32) {
    %c0_i32 = arith.constant 0 : i32
    %c0_i32_0 = arith.constant 0 : i32
    %c0_i32_1 = arith.constant 0 : i32
    return %c0_i32, %c0_i32_0 : i32, i32
  }
  func.func @transform_3(%arg0: i32) -> (i32, i32) {
    %c0_i32 = arith.constant 0 : i32
    %c0_i32_0 = arith.constant 0 : i32
    %c0_i32_1 = arith.constant 0 : i32
    return %c0_i32, %c0_i32_0 : i32, i32
  }
  func.func @transform_4(%arg0: i32) -> (i32, i32) {
    %c0_i32 = arith.constant 0 : i32
    %c0_i32_0 = arith.constant 0 : i32
    %c0_i32_1 = arith.constant 0 : i32
    return %c0_i32, %c0_i32_0 : i32, i32
  }
  func.func @transform_5(%arg0: i32) -> (i32, i32) {
    %c0_i32 = arith.constant 0 : i32
    %c0_i32_0 = arith.constant 0 : i32
    %c0_i32_1 = arith.constant 0 : i32
    return %c0_i32, %c0_i32_0 : i32, i32
  }
  func.func @transform_6(%arg0: i32) -> (i32, i32) {
    %c0_i32 = arith.constant 0 : i32
    %c0_i32_0 = arith.constant 0 : i32
    return %arg0, %c0_i32 : i32, i32
  }
}

</mosaic_0001>

<bundles_post_ra>
// kernel: resnet_block_fc.1
= control target key start
LH: loop header
LB: loop body
LE: loop exit
PB: predicated region body
PF: predicated region fallthrough
CT: control target
= control target key end

     0   :  { %11 = vsyncpa [#allocation3], 0  ;;  %s1848_s0 = inlined_call_operand.vmem [shape: f32[256,64], index: 0, kind: input, shape index: {}]   ;;  %s1849_s1 = inlined_call_operand.vmem [shape: f32[64,64], index: 1, kind: input, shape index: {}]   ;;  %s1850_s2 = inlined_call_operand.vmem [shape: f32[1,64], index: 2, kind: input, shape index: {}]   ;;  %s1851_s3 = inlined_call_operand.vmem [shape: f32[64,128], index: 3, kind: input, shape index: {}]   ;;  %s1852_s4 = inlined_call_operand.vmem [shape: f32[1,128], index: 4, kind: input, shape index: {}]   ;;  %s1853_s5 = inlined_call_operand.vmem [shape: f32[64,128], index: 5, kind: input, shape index: {}]   ;;  %s1854_s6 = inlined_call_operand.hbm [shape: f32[256,128], index: 6, kind: output, shape index: {}]  }
   0x1   :  { %13 = vsyncpa [#allocation3 + $0x1], 0  ;;  %s1497_s21 = smov 0   ;;  %s1499_s22 = smov 0  }
   0x2   :  { %s1501_s23 = smov 0   ;;  %s1503_s24 = smov 0  }
   0x3 LB: > { %s1518_s25 = sadd.s32 4294967295, %s1457_s24   ;;  %s1011_s26 = sadd.s32 4294967294, %s1457_s24   ;;  %s1457_s24 = sphi %s1503_s24, %s1860_s24   ;;  %s1453_s23 = sphi %s1501_s23, %s1859_s23   ;;  %s1449_s22 = sphi %s1499_s22, %s1858_s22   ;;  %s1445_s21 = sphi %s1497_s21, %s1857_s21  }
   0x4   : > { %s1522_s27 = sadd.s32 1, %s1457_s24   ;;  %s157_s28 = sadd.s32 1, %s1453_s23 }
   0x5   : > { %s154_s29 = ssub.s32 %s1457_s24, %s1522_s27  ;;  %p167_p0 = scmp.ne.s32.totalorder %s1453_s23, %s1449_s22 }
   0x6   : > { %p155_p1 = scmp.eq.s32.totalorder %s154_s29, 0  ;;  %p168_p2 = scmp.eq.s32.totalorder %s1518_s25, 1 }
   0x7   : > { %p173_p3 = scmp.ne.s32.totalorder %s1449_s22, %s1445_s21  ;;  %p174_p4 = scmp.eq.s32.totalorder %s1011_s26, 1 }
   0x8   : > { %s1533_s30 = scalar_select %p155_p1, %s1453_s23, %s157_s28  }
   0x9   : > { %p1535_p5 = por %p168_p2, %p167_p0  ;;  %p1539_p6 = por %p174_p4, %p173_p3 }
   0xa   : > { %p1014_p7 = scmp.ge.s32.totalorder %s1457_s24, 1  ;;  %p216_p8 = scmp.lt.s32.totalorder %s1457_s24, 3 }
   0xc   : > { %p217_p9 = pnand %p1014_p7, %p216_p8 }
   0xd   : > { %v285_v0 = vld [vmem:[%s1849_s1] sm:$0xff] (!%p217_p9)  ;;  %v286_v1 = vld [vmem:[%s1849_s1 + $0x8] sm:$0xff] (!%p217_p9)  ;;  %v287_v2 = vld [vmem:[%s1849_s1 + $0x10] sm:$0xff] (!%p217_p9)  ;;  %s1016_s15 = sshll.u32 (!%p217_p9), %s1518_s25, 4  ;;  %vm300_vm0 = vcmask (!%p217_p9), 523264   ;;  %s243_s20 = sand.u32 (!%p217_p9), 1, %s1449_s22  }
   0xe   : > { %220 = sbr.rel (%p217_p9) target bundleno = 540 (0x21c), region = 44  ;;  %v1266_v3 = vpack.c.bf16 (!%p217_p9), %v286_v1, %v285_v0  ;;  %v288_v4 = vld [vmem:[%s1849_s1 + $0x18] sm:$0xff] (!%p217_p9)  ;;  %p247_p10 = scmp.lt.s32.totalorder (!%p217_p9), %s1016_s15, 31  ;;  %v289_v6 = vld [vmem:[%s1849_s1 + $0x20] sm:$0xff] (!%p217_p9)  ;;  %v290_v7 = vld [vmem:[%s1849_s1 + $0x28] sm:$0xff] (!%p217_p9) }
   0xf   : > { %v1270_v5 = vpack.c.bf16 (!%p217_p9), %v288_v4, %v287_v2  ;;  %v510_v8 = vld [vmem:[%s1851_s3] sm:$0xff] (!%p217_p9)  ;;  %v511_v9 = vld [vmem:[%s1851_s3 + $0x8] sm:$0xff] (!%p217_p9)  ;;  %v512_v10 = vld [vmem:[%s1851_s3 + $0x10] sm:$0xff] (!%p217_p9)  ;;  %v1274_v13 = vpack.c.bf16 (!%p217_p9), %v290_v7, %v289_v6  ;;  %s1073_s9 = sshll.u32 (!%p217_p9), %s1518_s25, 11  ;;  %s1807_s25 = scalar_lea.sflag (!%p217_p9), [#allocation3], %s243_s20 }
  0x10   : > { %1267 = vmatprep.subr.bf16.mxu0 (!%p217_p9), %v1266_v3  ;;  %v513_v11 = vld [vmem:[%s1851_s3 + $0x18] sm:$0xff] (!%p217_p9)  ;;  %v1282_v12 = vpack.c.bf16 (!%p217_p9), %v511_v9, %v510_v8  ;;  %v291_v14 = vld [vmem:[%s1849_s1 + $0x30] sm:$0xff] (!%p217_p9)  ;;  %v514_v18 = vld [vmem:[%s1851_s3 + $0x20] sm:$0xff] (!%p217_p9)  ;;  %s1799_s13 = scalar_lea.hbm (!%p217_p9), %s1854_s6, %s1073_s9 }
  0x11   : > { %1269 = vmatpush3.bf16.msra.mxu0 (!%p217_p9), %v1266_v3  ;;  %v292_v15 = vld [vmem:[%s1849_s1 + $0x38] sm:$0xff] (!%p217_p9)  ;;  %v1286_v16 = vpack.c.bf16 (!%p217_p9), %v513_v11, %v512_v10  ;;  %v515_v19 = vld [vmem:[%s1851_s3 + $0x28] sm:$0xff] (!%p217_p9)  ;;  %v516_v53 = vld [vmem:[%s1851_s3 + $0x30] sm:$0xff] (!%p217_p9) }
  0x12   : > { %1271 = vmatprep.subr.bf16.mxu0 (!%p217_p9), %v1270_v5  ;;  %1314 = vmatprep.subr.bf16.mxu1 (!%p217_p9), %v1282_v12  ;;  %v1278_v21 = vpack.c.bf16 (!%p217_p9), %v292_v15, %v291_v14  ;;  %v1290_v22 = vpack.c.bf16 (!%p217_p9), %v515_v19, %v514_v18  ;;  %v517_v54 = vld [vmem:[%s1851_s3 + $0x38] sm:$0xff] (!%p217_p9)  ;;  %v718_v56 = vld [vmem:[%s1853_s5] sm:$0xff] (!%p217_p9)  ;;  %v719_v57 = vld [vmem:[%s1853_s5 + $0x8] sm:$0xff] (!%p217_p9) }
  0x13   : > { %1318 = vmatpush3.bf16.msra.mxu1 (!%p217_p9), %v1282_v12  ;;  %v1294_v55 = vpack.c.bf16 (!%p217_p9), %v517_v54, %v516_v53  ;;  %v1298_v58 = vpack.c.bf16 (!%p217_p9), %v719_v57, %v718_v56  ;;  %v1688_v59 = vld [vmem:[%s1850_s2] ss:$0 sm:$0xff] (!%p217_p9) }
  0x14   : > { %1315 = vmatprep.subr.bf16.mxu1 (!%p217_p9), %v1286_v16 }
  0x15   : > { %s1862_s15 = smov (!%p247_p10, %s1016_s15), 31  ;;  %1273 = vmatpush3.bf16.msra.mxu0 %v1270_v5 }
  0x16   : > { %s1017_s16 = sshll.u32 %s1862_s15, 3  ;;  %1275 = vmatprep.subr.bf16.mxu0 %v1274_v13 }
  0x17   : > { %s1585_s29 = scalar_lea.vmem %s1848_s0, %s1017_s16  ;;  %1319 = vmatpush3.bf16.msra.mxu1 %v1286_v16  ;;  %s1459_s16 = smov [#allocation2]  }
  0x18   : > { %v1588_v17 = vld [vmem:[%s1585_s29] sm:$0xff]  ;;  %v1599_v23 = vld [vmem:[%s1585_s29 + $0x8] sm:$0xff]  ;;  %1316 = vmatprep.subr.bf16.mxu1 %v1290_v22  ;;  %v1602_v24 = vld [vmem:[%s1585_s29 + $0x10] sm:$0xff]  ;;  %s1399_s17 = sshll.u32 %s1459_s16, 4  ;;  %s1400_s17 = int_to_ptr.vmem [resolvable:$false] %s1399_s17 }
  0x19   : > { %v269_v20 = vmax.f32 %v1588_v17, 0.0  ;;  %1277 = vmatpush3.bf16.msra.mxu0 %v1274_v13  ;;  %v270_v25 = vmax.f32 %v1599_v23, 0.0  ;;  %v271_v26 = vmax.f32 %v1602_v24, 0.0  ;;  %v1607_v27 = vld [vmem:[%s1585_s29 + $0x18] sm:$0xff]  ;;  %v1610_v28 = vld [vmem:[%s1585_s29 + $0x20] sm:$0xff]  ;;  %v1617_v31 = vld [vmem:[%s1585_s29 + $0x28] sm:$0xff] }
  0x1a   : > { %1279 = vmatprep.subr.bf16.mxu0 %v1278_v21  ;;  %v272_v29 = vmax.f32 %v1607_v27, 0.0  ;;  %v273_v30 = vmax.f32 %v1610_v28, 0.0  ;;  %v1620_v32 = vld [vmem:[%s1585_s29 + $0x30] sm:$0xff]  ;;  %v274_v33 = vmax.f32 %v1617_v31, 0.0  ;;  %v1627_v35 = vld [vmem:[%s1585_s29 + $0x38] sm:$0xff]  ;;  %v1630_v36 = vld [vmem:[%s1585_s29 + $0x40] sm:$0xff] }
  0x1b   : > { %1162 = vmatprep.mubr.msk.f32.mxu0 %vm300_vm0, %v269_v20  ;;  %1320 = vmatpush3.bf16.msra.mxu1 %v1290_v22  ;;  %v275_v34 = vmax.f32 %v1620_v32, 0.0  ;;  %v276_v37 = vmax.f32 %v1627_v35, 0.0  ;;  %v277_v38 = vmax.f32 %v1630_v36, 0.0  ;;  %v1637_v39 = vld [vmem:[%s1585_s29 + $0x48] sm:$0xff]  ;;  %v1640_v40 = vld [vmem:[%s1585_s29 + $0x50] sm:$0xff]  ;;  %v1647_v43 = vld [vmem:[%s1585_s29 + $0x58] sm:$0xff] }
  0x1c   : > { %v278_v41 = vmax.f32 %v1637_v39, 0.0  ;;  %v279_v42 = vmax.f32 %v1640_v40, 0.0  ;;  %v1650_v44 = vld [vmem:[%s1585_s29 + $0x60] sm:$0xff]  ;;  %v280_v45 = vmax.f32 %v1647_v43, 0.0  ;;  %v1657_v47 = vld [vmem:[%s1585_s29 + $0x68] sm:$0xff]  ;;  %v1660_v48 = vld [vmem:[%s1585_s29 + $0x70] sm:$0xff]  ;;  %1317 = vmatprep.subr.bf16.mxu1 %v1294_v55 }
  0x1d   : > { %1281 = vmatpush3.bf16.msra.mxu0 %v1278_v21  ;;  %v281_v46 = vmax.f32 %v1650_v44, 0.0  ;;  %v282_v49 = vmax.f32 %v1657_v47, 0.0  ;;  %v283_v50 = vmax.f32 %v1660_v48, 0.0  ;;  %v1667_v51 = vld [vmem:[%s1585_s29 + $0x78] sm:$0xff]  ;;  %s1015_s29 = sshll.u32 %s243_s20, 7  ;;  %s1401_s18 = scalar_lea.vmem %s1400_s17, 4096 }
  0x1e   : > { %1283 = vmatprep.subr.bf16.mxu0 %v1282_v12  ;;  %v284_v52 = vmax.f32 %v1667_v51, 0.0  ;;  %s1778_s15 = scalar_lea.vmem [#allocation2], %s1015_s29 }
  0x1f   : > { %1321 = vmatpush3.bf16.msra.mxu1 %v1294_v55  ;;  %s949_s10 = sshll.u32 %s1778_s15, 4  ;;  %s1801_s10 = int_to_ptr.vmem [resolvable:$true] %s949_s10 }
  0x20   : > { %1163 = vmatmul.mubr.msk.f32.vlgmr.msra.gmra.mrb[0].mxu0 %vm300_vm0, %v270_v25  ;;  %1299 = vmatprep.subr.bf16.mxu1 %v1298_v58  ;;  %s1395_s14 = scalar_lea.vmem %s1801_s10, 2048  ;;  %p1402_p0 = scmp.lt.s32.totalorder %s1801_s10, %s1400_s17 }
  0x21   : > { %1165 = vmatprep.mubr.msk.f32.mxu0 %vm300_vm0, %v271_v26  ;;  %1285 = vmatpush3.bf16.msra.mxu0 %v1282_v12  ;;  %p1396_p11 = scmp.ne.s32.totalorder %s1801_s10, %s1395_s14  ;;  %p1403_p1 = scmp.lt.s32.totalorder %s1401_s18, %s1395_s14 }
  0x22   : > { %1287 = vmatprep.subr.bf16.mxu0 %v1286_v16 }
  0x23   : > { %p1397_p12 = pnand %p1396_p11, %p1535_p5  ;;  %p1404_p2 = por %p1403_p1, %p1402_p0 }
  0x24   : > { %1166 = vmatmul.mubr.msk.f32.gmra.mrb[2].mxu0 %vm300_vm0, %v272_v29  ;;  %v720_v29 = vld [vmem:[%s1853_s5 + $0x10] sm:$0xff] }
  0x25   : > { %1168 = vmatprep.mubr.msk.f32.mxu0 %vm300_vm0, %v273_v30  ;;  %1289 = vmatpush3.bf16.msra.mxu0 %v1286_v16  ;;  %v721_v30 = vld [vmem:[%s1853_s5 + $0x18] sm:$0xff]  ;;  %p1398_p13 = pneg %p1397_p12 }
  0x26   : > { %1291 = vmatprep.subr.bf16.mxu0 %v1290_v22 }
  0x27   : > { %p1405_p3 = pnand %p1404_p2, %p1398_p13 }
  0x28   : > { %1169 = vmatmul.mubr.msk.f32.gmra.mrb[4].mxu0 %vm300_vm0, %v274_v33 }
  0x29   : > { %1171 = vmatprep.mubr.msk.f32.mxu0 %vm300_vm0, %v275_v34  ;;  %1293 = vmatpush3.bf16.msra.mxu0 %v1290_v22 }
  0x2a   : > { %1295 = vmatprep.subr.bf16.mxu0 %v1294_v55 }
  0x2c   : > { %1172 = vmatmul.mubr.msk.f32.gmra.mrb[6].mxu0 %vm300_vm0, %v276_v37 }
  0x2d   : > { %1174 = vmatprep.mubr.msk.f32.mxu0 %vm300_vm0, %v277_v38  ;;  %1297 = vmatpush3.bf16.msra.mxu0 %v1294_v55 }
  0x30   : > { %1175 = vmatmul.mubr.msk.f32.gmra.mrb[8].mxu0 %vm300_vm0, %v278_v41 }
  0x31   : > { %1177 = vmatprep.mubr.msk.f32.mxu0 %vm300_vm0, %v279_v42  ;;  %v1302_v42 = vpack.c.bf16 %v721_v30, %v720_v29 }
  0x34   : > { %1178 = vmatmul.mubr.msk.f32.gmra.mrb[10].mxu0 %vm300_vm0, %v280_v45 }
  0x35   : > { %1180 = vmatprep.mubr.msk.f32.mxu0 %vm300_vm0, %v281_v46  ;;  %v722_v46 = vld [vmem:[%s1853_s5 + $0x20] sm:$0xff] }
  0x38   : > { %1181 = vmatmul.mubr.msk.f32.gmra.mrb[12].mxu0 %vm300_vm0, %v282_v49  ;;  %v723_v49 = vld [vmem:[%s1853_s5 + $0x28] sm:$0xff] }
  0x39   : > { %1183 = vmatprep.mubr.msk.f32.mxu0 %vm300_vm0, %v283_v50  ;;  %v1306_v56 = vpack.c.bf16 %v723_v49, %v722_v46 }
  0x3c   : > { %1184 = vmatmul.mubr.msk.f32.gmra.mrb[14].mxu0 %vm300_vm0, %v284_v52 }
  0xf3   : > { %v1164_v60 = vpop.f32.mrb[0].mxu0 }
  0xf4   : > { %v421_v61 = vadd.f32 %v1164_v60, %v1688_v59  ;;  %v415_v62 = vpop.f32.mrb[1].mxu0  ;;  %v724_v60 = vld [vmem:[%s1853_s5 + $0x30] sm:$0xff] }
  0xf5   : > { %v416_v63 = vadd.f32 %v1688_v59, %v415_v62 }
  0xf6   : > { %v495_v2 = vmax.f32 %v421_v61, 0.0  ;;  %v725_v61 = vld [vmem:[%s1853_s5 + $0x38] sm:$0xff] }
  0xf7   : > { %v494_v0 = vmax.f32 %v416_v63, 0.0  ;;  %v1167_v1 = vpop.f32.mrb[2].mxu0 }
  0xf8   : > { %v431_v3 = vadd.f32 %v1167_v1, %v1688_v59  ;;  %v425_v4 = vpop.f32.mrb[3].mxu0 }
  0xf9   : > { %v426_v5 = vadd.f32 %v1688_v59, %v425_v4  ;;  %1202 = vmatprep.mubr.msk.f32.mxu0 %vm300_vm0, %v494_v0 }
  0xfa   : > { %1203 = vmatmul.mubr.msk.f32.vlgmr.msra.gmra.mrb[16].mxu0 %vm300_vm0, %v495_v2  ;;  %v497_v8 = vmax.f32 %v431_v3, 0.0  ;;  %v1310_v2 = vpack.c.bf16 %v725_v61, %v724_v60 }
  0xfb   : > { %v496_v6 = vmax.f32 %v426_v5, 0.0  ;;  %v1170_v7 = vpop.f32.mrb[4].mxu0 }
  0xfc   : > { %v441_v9 = vadd.f32 %v1170_v7, %v1688_v59  ;;  %v435_v10 = vpop.f32.mrb[5].mxu0 }
  0xfd   : > { %v436_v11 = vadd.f32 %v1688_v59, %v435_v10  ;;  %1205 = vmatprep.mubr.msk.f32.mxu0 %vm300_vm0, %v496_v6 }
  0xfe   : > { %1206 = vmatmul.mubr.msk.f32.gmra.mrb[18].mxu0 %vm300_vm0, %v497_v8  ;;  %v499_v14 = vmax.f32 %v441_v9, 0.0 }
  0xff   : > { %v498_v12 = vmax.f32 %v436_v11, 0.0  ;;  %v1173_v13 = vpop.f32.mrb[6].mxu0 }
 0x100   : > { %v451_v15 = vadd.f32 %v1173_v13, %v1688_v59  ;;  %v445_v16 = vpop.f32.mrb[7].mxu0 }
 0x101   : > { %v446_v18 = vadd.f32 %v1688_v59, %v445_v16  ;;  %1208 = vmatprep.mubr.msk.f32.mxu0 %vm300_vm0, %v498_v12 }
 0x102   : > { %1209 = vmatmul.mubr.msk.f32.gmra.mrb[20].mxu0 %vm300_vm0, %v499_v14  ;;  %v501_v21 = vmax.f32 %v451_v15, 0.0 }
 0x103   : > { %v500_v19 = vmax.f32 %v446_v18, 0.0  ;;  %v1176_v20 = vpop.f32.mrb[8].mxu0 }
 0x104   : > { %v461_v22 = vadd.f32 %v1176_v20, %v1688_v59  ;;  %v455_v25 = vpop.f32.mrb[9].mxu0 }
 0x105   : > { %v456_v26 = vadd.f32 %v1688_v59, %v455_v25  ;;  %1211 = vmatprep.mubr.msk.f32.mxu0 %vm300_vm0, %v500_v19 }
 0x106   : > { %1212 = vmatmul.mubr.msk.f32.gmra.mrb[22].mxu0 %vm300_vm0, %v501_v21  ;;  %v503_v37 = vmax.f32 %v461_v22, 0.0 }
 0x107   : > { %v502_v33 = vmax.f32 %v456_v26, 0.0  ;;  %v1179_v34 = vpop.f32.mrb[10].mxu0 }
 0x108   : > { %v471_v38 = vadd.f32 %v1179_v34, %v1688_v59  ;;  %v465_v41 = vpop.f32.mrb[11].mxu0 }
 0x109   : > { %v466_v45 = vadd.f32 %v1688_v59, %v465_v41  ;;  %1214 = vmatprep.mubr.msk.f32.mxu1 %vm300_vm0, %v502_v33 }
 0x10a   : > { %1215 = vmatmul.mubr.msk.f32.vlgmr.msra.gmra.mrb[0].mxu1 %vm300_vm0, %v503_v37  ;;  %v505_v53 = vmax.f32 %v471_v38, 0.0 }
 0x10b   : > { %v504_v50 = vmax.f32 %v466_v45, 0.0  ;;  %1301 = vmatpush3.bf16.msra.mxu1 %v1298_v58  ;;  %v1182_v52 = vpop.f32.mrb[12].mxu0 }
 0x10c   : > { %v481_v54 = vadd.f32 %v1182_v52, %v1688_v59  ;;  %v475_v55 = vpop.f32.mrb[13].mxu0  ;;  %1303 = vmatprep.subr.bf16.mxu1 %v1302_v42 }
 0x10d   : > { %v476_v57 = vadd.f32 %v1688_v59, %v475_v55  ;;  %1217 = vmatprep.mubr.msk.f32.mxu1 %vm300_vm0, %v504_v50 }
 0x10e   : > { %1218 = vmatmul.mubr.msk.f32.gmra.mrb[2].mxu1 %vm300_vm0, %v505_v53  ;;  %v507_v63 = vmax.f32 %v481_v54, 0.0 }
 0x10f   : > { %v506_v58 = vmax.f32 %v476_v57, 0.0  ;;  %1305 = vmatpush3.bf16.msra.mxu1 %v1302_v42  ;;  %v1185_v62 = vpop.f32.mrb[14].mxu0 }
 0x110   : > { %v491_v0 = vadd.f32 %v1185_v62, %v1688_v59  ;;  %v485_v1 = vpop.f32.mrb[15].mxu0  ;;  %1307 = vmatprep.subr.bf16.mxu1 %v1306_v56 }
 0x111   : > { %v486_v3 = vadd.f32 %v1688_v59, %v485_v1  ;;  %1220 = vmatprep.mubr.msk.f32.mxu1 %vm300_vm0, %v506_v58 }
 0x112   : > { %1221 = vmatmul.mubr.msk.f32.gmra.mrb[4].mxu1 %vm300_vm0, %v507_v63  ;;  %v509_v5 = vmax.f32 %v491_v0, 0.0 }
 0x113   : > { %v508_v4 = vmax.f32 %v486_v3, 0.0  ;;  %1309 = vmatpush3.bf16.msra.mxu1 %v1306_v56 }
 0x114   : > { %1311 = vmatprep.subr.bf16.mxu1 %v1310_v2 }
 0x115   : > { %1223 = vmatprep.mubr.msk.f32.mxu1 %vm300_vm0, %v508_v4 }
 0x116   : > { %1224 = vmatmul.mubr.msk.f32.gmra.mrb[6].mxu1 %vm300_vm0, %v509_v5 }
 0x117   : > { %1313 = vmatpush3.bf16.msra.mxu1 %v1310_v2  ;;  %1242 = vmatprep.mubr.msk.f32.mxu1 %vm300_vm0, %v1588_v17 }
 0x11a   : > { %1243 = vmatmul.mubr.msk.f32.vlgmr.msra.gmra.mrb[8].mxu1 %vm300_vm0, %v1599_v23 }
 0x11b   : > { %1245 = vmatprep.mubr.msk.f32.mxu1 %vm300_vm0, %v1602_v24 }
 0x11e   : > { %1246 = vmatmul.mubr.msk.f32.gmra.mrb[10].mxu1 %vm300_vm0, %v1607_v27 }
 0x11f   : > { %1248 = vmatprep.mubr.msk.f32.mxu1 %vm300_vm0, %v1610_v28 }
 0x122   : > { %1249 = vmatmul.mubr.msk.f32.gmra.mrb[12].mxu1 %vm300_vm0, %v1617_v31 }
 0x123   : > { %1251 = vmatprep.mubr.msk.f32.mxu1 %vm300_vm0, %v1620_v32 }
 0x126   : > { %1252 = vmatmul.mubr.msk.f32.gmra.mrb[14].mxu1 %vm300_vm0, %v1627_v35 }
 0x127   : > { %1254 = vmatprep.mubr.msk.f32.mxu1 %vm300_vm0, %v1630_v36  ;;  %v1035_v36 = vld [vmem:[%s1852_s4] ss:$0 sm:$0xff] }
 0x12a   : > { %1255 = vmatmul.mubr.msk.f32.gmra.mrb[0].mxu1 %vm300_vm0, %v1637_v39 }
 0x12b   : > { %1257 = vmatprep.mubr.msk.f32.mxu1 %vm300_vm0, %v1640_v40 }
 0x12e   : > { %1258 = vmatmul.mubr.msk.f32.gmra.mrb[2].mxu1 %vm300_vm0, %v1647_v43 }
 0x12f   : > { %1260 = vmatprep.mubr.msk.f32.mxu1 %vm300_vm0, %v1650_v44 }
 0x132   : > { %1261 = vmatmul.mubr.msk.f32.gmra.mrb[4].mxu1 %vm300_vm0, %v1657_v47 }
 0x133   : > { %1263 = vmatprep.mubr.msk.f32.mxu1 %vm300_vm0, %v1660_v48 }
 0x136   : > { %1264 = vmatmul.mubr.msk.f32.gmra.mrb[6].mxu1 %vm300_vm0, %v1667_v51 }
 0x1cd   : > { %v1204_v17 = vpop.f32.mrb[16].mxu0 }
 0x1ce   : > { %v639_v23 = vpop.f32.mrb[17].mxu0  ;;  %v645_v39 = vadd.f32 %v1204_v17, %v1035_v36 }
 0x1cf   : > { %v640_v40 = vadd.f32 %v1035_v36, %v639_v23 }
 0x1d1   : > { %v1207_v24 = vpop.f32.mrb[18].mxu0 }
 0x1d2   : > { %v649_v27 = vpop.f32.mrb[19].mxu0  ;;  %v655_v51 = vadd.f32 %v1207_v24, %v1035_v36 }
 0x1d3   : > { %v650_v59 = vadd.f32 %v1035_v36, %v649_v27 }
 0x1d5   : > { %v1210_v28 = vpop.f32.mrb[20].mxu0 }
 0x1d6   : > { %v659_v31 = vpop.f32.mrb[21].mxu0  ;;  %v665_v10 = vadd.f32 %v1210_v28, %v1035_v36 }
 0x1d7   : > { %v660_v11 = vadd.f32 %v1035_v36, %v659_v31 }
 0x1d9   : > { %v1213_v32 = vpop.f32.mrb[22].mxu0 }
 0x1da   : > { %v669_v35 = vpop.f32.mrb[23].mxu0  ;;  %v675_v16 = vadd.f32 %v1213_v32, %v1035_v36 }
 0x1db   : > { %v670_v18 = vadd.f32 %v1035_v36, %v669_v35 }
 0x1ed   : > { %v1244_v43 = vpop.f32.mrb[8].mxu1 }
 0x1ee   : > { %v846_v44 = vadd.f32 %v1244_v43, %v645_v39  ;;  %v840_v47 = vpop.f32.mrb[9].mxu1 }
 0x1ef   : > { %v841_v48 = vadd.f32 %v840_v47, %v640_v40 }
 0x1f0   : > { %920 = vst [vmem:[%s1778_s15 + $0x8] sm:$0xff] %v846_v44 }
 0x1f1   : > { %919 = vst [vmem:[%s1778_s15] sm:$0xff] %v841_v48  ;;  %v1247_v6 = vpop.f32.mrb[10].mxu1 }
 0x1f2   : > { %v856_v7 = vadd.f32 %v1247_v6, %v655_v51  ;;  %v850_v8 = vpop.f32.mrb[11].mxu1 }
 0x1f3   : > { %v851_v9 = vadd.f32 %v850_v8, %v650_v59 }
 0x1f4   : > { %922 = vst [vmem:[%s1778_s15 + $0x18] sm:$0xff] %v856_v7 }
 0x1f5   : > { %921 = vst [vmem:[%s1778_s15 + $0x10] sm:$0xff] %v851_v9  ;;  %v1250_v12 = vpop.f32.mrb[12].mxu1 }
 0x1f6   : > { %v866_v13 = vadd.f32 %v1250_v12, %v665_v10  ;;  %v860_v14 = vpop.f32.mrb[13].mxu1 }
 0x1f7   : > { %v861_v15 = vadd.f32 %v860_v14, %v660_v11 }
 0x1f8   : > { %924 = vst [vmem:[%s1778_s15 + $0x28] sm:$0xff] %v866_v13 }
 0x1f9   : > { %923 = vst [vmem:[%s1778_s15 + $0x20] sm:$0xff] %v861_v15  ;;  %v1253_v19 = vpop.f32.mrb[14].mxu1 }
 0x1fa   : > { %v876_v20 = vadd.f32 %v1253_v19, %v675_v16  ;;  %v870_v21 = vpop.f32.mrb[15].mxu1 }
 0x1fb   : > { %v871_v22 = vadd.f32 %v870_v21, %v670_v18 }
 0x1fc   : > { %926 = vst [vmem:[%s1778_s15 + $0x38] sm:$0xff] %v876_v20 }
 0x1fd   : > { %925 = vst [vmem:[%s1778_s15 + $0x30] sm:$0xff] %v871_v22  ;;  %v1256_v25 = vpop.f32.mrb[0].mxu1 }
 0x1fe   : > { %v1338_v26 = vadd.f32 %v1256_v25, %v1035_v36  ;;  %v880_v29 = vpop.f32.mrb[1].mxu1 }
 0x1ff   : > { %v1339_v30 = vadd.f32 %v1035_v36, %v880_v29 }
 0x200   : > { %928 = vst [vmem:[%s1778_s15 + $0x48] sm:$0xff] %v1338_v26 }
 0x201   : > { %927 = vst [vmem:[%s1778_s15 + $0x40] sm:$0xff] %v1339_v30  ;;  %v1259_v33 = vpop.f32.mrb[2].mxu1 }
 0x202   : > { %v1340_v34 = vadd.f32 %v1259_v33, %v1035_v36  ;;  %v890_v37 = vpop.f32.mrb[3].mxu1 }
 0x203   : > { %v1341_v38 = vadd.f32 %v1035_v36, %v890_v37 }
 0x204   : > { %930 = vst [vmem:[%s1778_s15 + $0x58] sm:$0xff] %v1340_v34 }
 0x205   : > { %929 = vst [vmem:[%s1778_s15 + $0x50] sm:$0xff] %v1341_v38  ;;  %v1262_v41 = vpop.f32.mrb[4].mxu1 }
 0x206   : > { %v1342_v42 = vadd.f32 %v1262_v41, %v1035_v36  ;;  %v900_v45 = vpop.f32.mrb[5].mxu1 }
 0x207   : > { %v1343_v46 = vadd.f32 %v1035_v36, %v900_v45 }
 0x208   : > { %932 = vst [vmem:[%s1778_s15 + $0x68] sm:$0xff] %v1342_v42 }
 0x209   : > { %931 = vst [vmem:[%s1778_s15 + $0x60] sm:$0xff] %v1343_v46  ;;  %v1265_v49 = vpop.f32.mrb[6].mxu1 }
 0x20a   : > { %v1344_v50 = vadd.f32 %v1265_v49, %v1035_v36  ;;  %v910_v52 = vpop.f32.mrb[7].mxu1 }
 0x20b   : > { %v1345_v53 = vadd.f32 %v1035_v36, %v910_v52 }
 0x20c   : > { %934 = vst [vmem:[%s1778_s15 + $0x78] sm:$0xff] %v1344_v50 }
 0x20d   : > { %933 = vst [vmem:[%s1778_s15 + $0x70] sm:$0xff] %v1345_v53 }
 0x20e   : > { %1408 = shalt.err (!%p1405_p3)
}
 0x20f   : > { %s1409_s19 = scalar_lea.hbm %s1799_s13, 2048  ;;  %s1413_s28 = scalar_lea.hbm %s1854_s6, 4096 }
 0x210   : > { %p1410_p4 = scmp.ne.s32.totalorder %s1799_s13, %s1409_s19  ;;  %p1414_p9 = scmp.lt.u32.totalorder %s1799_s13, %s1854_s6 }
 0x211   : > { %p1415_p10 = scmp.lt.u32.totalorder %s1413_s28, %s1409_s19  ;;  %p1417_p12 = scmp.lt.u32.totalorder %s1409_s19, %s1799_s13 }
 0x212   : > { %p1411_p7 = pnand %p1410_p4, %p1535_p5 }
 0x213   : > { %p1416_p11 = por %p1415_p10, %p1414_p9 }
 0x214   : > { %p1412_p8 = pneg %p1411_p7 }
 0x215   : > { %p1418_p13 = por %p1417_p12, %p1416_p11 }
 0x217   : > { %p1419_p0 = pnand %p1418_p13, %p1412_p8 }
 0x219   : > { %1422 = shalt.err (!%p1419_p0)
}
 0x21a   : > { %s1460_s9 = smov 128   ;;  %s1461_s11 = smov 8  }
 0x21b   : > { %1354 = dma.vmem_to_hbm [thread:$0]  (%p1535_p5), %s1801_s10, 2048, %s1799_s13, %s1807_s25, %s1460_s9, %s1460_s9, %s1461_s11  }
 0x21c PF: > { %p1360_p1 = scmp.ge.s32.totalorder %s1457_s24, 2  ;;  %s964_s12 = sand.u32 1, %s1445_s21  }
 0x21d   : > { %s965_s14 = scalar_lea.sflag [#allocation3], %s964_s12 }
 0x21e   : > { %p1357_p2 = pnand %p1360_p1, %p1539_p6 }
 0x220   : > { %1440 = dma.done.wait (!%p1357_p2), %s965_s14, 2048  }
 0x221   : > { %1442 = vsyncadd (!%p1357_p2), %s965_s14, 4294965248  ;;  %p16_p3 = scmp.ge.s32.totalorder %s1522_s27, 4   ;;  %s1857_s21 = smov %s1449_s22 }
 0x222   : > { %s1858_s22 = smov %s1453_s23  ;;  %s1859_s23 = smov %s1533_s30 }
 0x223   : > { %s1860_s24 = smov %s1522_s27  ;;  %18 = sbr.rel (!%p16_p3) target bundleno = 3 (0x3), region = 79 }
 0x22a   :  { %970 = vsyncpa [#allocation3], 1 }
 0x22b   :  { %972 = vsyncpa [#allocation3 + $0x1], 1 }

</bundles_post_ra>
